<compile_context>
chip_gen: v5e
topology: v5e:2x2
jax: 0.10.0
libtpu: 0.0.40
codegen_flags: <defaults>
</compile_context>

<pallas_src>
import functools

import jax
import jax.numpy as jnp
from jax.experimental import pallas as pl
from jax.experimental.pallas import tpu as pltpu


# --------------------------------------------------------------------------------------
# Pallas kernel: Bt articles per grid step.  Inputs are pre-padded/flattened by the wrapper.
# --------------------------------------------------------------------------------------
def npa_news_encoder_kernel(x_ref, proj_ref, wc_ref, bc_ref, o_ref, *, L, Lp, Bt):
    # x_ref    : (Bt*Lp, d_we) bf16   per-article rows: [x_0 .. x_{L-1}, 0, ..., 0] (Lp rows each)
    # proj_ref : (Bt, 1, F)    f32    tanh(pref_q @ Wp + bp), one row per article
    # wc_ref   : (3, d_we, F)  bf16   conv taps
    # bc_ref   : (1, F)        f32    conv bias
    # o_ref    : (Bt, 1, F)    f32
    F = o_ref.shape[-1]
    N = Bt * Lp

    x = x_ref[...]                                                         # (N, d_we) bf16

    # --- conv taps: three MXU matmuls with M = Bt*Lp, f32 accumulation --------------------
    y0 = jnp.dot(x, wc_ref[0], preferred_element_type=jnp.float32)         # (N, F)
    y1 = jnp.dot(x, wc_ref[1], preferred_element_type=jnp.float32)         # (N, F)
    y2 = jnp.dot(x, wc_ref[2], preferred_element_type=jnp.float32)         # (N, F)

    # Combine taps with shifted slices.  Each article ends with >= 1 zero-pad row (Lp >= L+1),
    # so the "previous row" of an article's first word is a zero row of the previous article
    # (contributes 0) and the "next row" of its last word is its own zero-pad row.
    zero_row = jnp.zeros((1, F), jnp.float32)
    left = jnp.concatenate([zero_row, y0[:-1, :]], axis=0)                 # left[r]  = y0[r-1]
    right = jnp.concatenate([y2[1:, :], zero_row], axis=0)                 # right[r] = y2[r+1]
    c = jnp.maximum(y1 + left + right + bc_ref[...], 0.0)                  # (N, F) f32, ReLU

    # --- personalised attention over word positions ---------------------------------------
    c3 = c.reshape(Bt, Lp, F)                                              # layout-preserving (Lp % 8 == 0)
    proj = proj_ref[...]                                                   # (Bt, 1, F)
    scores = jnp.sum(c3 * proj, axis=2, keepdims=True)                     # (Bt, Lp, 1)

    # Mask pad rows (t >= L) out of the softmax.
    t_idx = jax.lax.broadcasted_iota(jnp.int32, (Bt, Lp, 1), 1)
    scores = jnp.where(t_idx < L, scores, jnp.float32(-1e30))

    m = jnp.max(scores, axis=1, keepdims=True)                             # (Bt, 1, 1)
    e = jnp.exp(scores - m)                                                # (Bt, Lp, 1)
    denom = jnp.sum(e, axis=1, keepdims=True)                              # (Bt, 1, 1)
    alpha = e / denom                                                      # (Bt, Lp, 1)

    out = jnp.sum(alpha * c3, axis=1, keepdims=True)                       # (Bt, 1, F)
    o_ref[...] = out.astype(o_ref.dtype)


def npa_news_encoder_pallas(embedd_words, u_id, params, *, target_rows=256):
    """embedd_words: (B, L, d_we) f32; u_id: (B,) int32.

    target_rows ~ desired Bt*Lp (M of the conv matmuls): 256 suits v6e/v7x, 128 is enough on v5e.
    """
    B, L, d_we = embedd_words.shape
    emb_table = params["emb_table"]          # (n_users, d_u_id)
    Wq, bq = params["Wq"], params["bq"]      # (d_u_id, d_pref), (1, d_pref)
    Wc, bc = params["Wc"], params["bc"]      # (3, d_we, F), (1, F)
    Wp, bp = params["Wp"], params["bp"]      # (d_pref, F), (1, F)
    K, _, F = Wc.shape

    # --- user-preference path hoisted out of the kernel (plain XLA) ------------------------
    u_emb = jnp.take(emb_table, u_id, axis=0)                              # (B, d_u_id)
    pref = jax.nn.relu(u_emb @ Wq + bq)                                    # (B, d_pref)
    proj = jnp.tanh(pref @ Wp + bp).astype(jnp.float32)                    # (B, F)

    # --- pad / tile sizes -------------------------------------------------------------------
    Lp = ((L + 1 + 7) // 8) * 8              # per-article rows: multiple of 8 and >= L+1
    bt = max(1, target_rows // Lp)
    # VMEM guard: words (double-buffered, bf16) + ~4 live f32 (Lp, F) temporaries per article.
    bytes_per_article = Lp * d_we * 2 * 2 + Lp * F * 4 * 4
    bt = max(1, min(bt, (8 * 1024 * 1024) // max(1, bytes_per_article)))
    Bt = min(bt, B)
    Bpad = pl.cdiv(B, Bt) * Bt

    # --- pad + flatten the word stream (bf16); pad proj over the batch ----------------------
    x = embedd_words.astype(jnp.bfloat16)
    x = jnp.pad(x, ((0, Bpad - B), (0, Lp - L), (0, 0)))                   # (Bpad, Lp, d_we)
    x2 = x.reshape(Bpad * Lp, d_we)
    proj3 = jnp.pad(proj, ((0, Bpad - B), (0, 0))).reshape(Bpad, 1, F)
    Wc_bf16 = Wc.astype(jnp.bfloat16)
    bc_f32 = bc.astype(jnp.float32)

    kernel = functools.partial(npa_news_encoder_kernel, L=L, Lp=Lp, Bt=Bt)
    out = pl.pallas_call(
        kernel,
        out_shape=jax.ShapeDtypeStruct((Bpad, 1, F), jnp.float32),
        grid=(Bpad // Bt,),
        in_specs=[
            pl.BlockSpec((Bt * Lp, d_we), lambda g: (g, 0)),     # padded/flattened words
            pl.BlockSpec((Bt, 1, F), lambda g: (g, 0, 0)),       # proj (per article)
            pl.BlockSpec((K, d_we, F), lambda g: (0, 0, 0)),     # conv weights (resident)
            pl.BlockSpec((1, F), lambda g: (0, 0)),              # conv bias
        ],
        out_specs=pl.BlockSpec((Bt, 1, F), lambda g: (g, 0, 0)),
        compiler_params=pltpu.CompilerParams(dimension_semantics=("parallel",)),
    )(x2, proj3, Wc_bf16, bc_f32)
    return out.reshape(Bpad, F)[:B]


# --------------------------------------------------------------------------------------
# Pure-JAX reference (same math, same bf16 matmul inputs) for a correctness check.
# --------------------------------------------------------------------------------------
def npa_news_encoder_ref(embedd_words, u_id, params):
    u_emb = jnp.take(params["emb_table"], u_id, axis=0)                    # (B, d_u_id)
    pref = jax.nn.relu(u_emb @ params["Wq"] + params["bq"])                # (B, d_pref)
    proj = jnp.tanh(pref @ params["Wp"] + params["bp"])                    # (B, F)
    x = embedd_words.astype(jnp.bfloat16)
    Wc = params["Wc"].astype(jnp.bfloat16)
    B, L, _ = embedd_words.shape
    xpad = jnp.pad(x, ((0, 0), (1, 1), (0, 0)))
    c = sum(jnp.einsum("bld,df->blf", xpad[:, k:k + L, :], Wc[k],
                       preferred_element_type=jnp.float32) for k in range(3))
    c = jax.nn.relu(c + params["bc"])                                      # (B, L, F)
    scores = jnp.einsum("blf,bf->bl", c, proj)
    alpha = jax.nn.softmax(scores, axis=-1)
    return jnp.einsum("bl,blf->bf", alpha, c)


if __name__ == "__main__":
    # Small shapes consistent with the module (scaled-down defaults).
    B, L = 4, 10           # batch, words per article
    d_we = 32              # word embedding dim      (default 300)
    n_filters = 128        # dim_articles / filters  (default 400)
    d_pref = 64            # preference query dim    (default 200)
    d_u_id = 16            # user id embedding dim   (default 50)
    n_users = 10
    K = 3

    key = jax.random.PRNGKey(0)
    ks = jax.random.split(key, 9)
    params = {
        "emb_table": jax.random.normal(ks[0], (n_users, d_u_id), jnp.float32) * 0.1,
        "Wq": jax.random.normal(ks[1], (d_u_id, d_pref), jnp.float32) * 0.1,
        "bq": jax.random.normal(ks[2], (1, d_pref), jnp.float32) * 0.1,
        "Wc": jax.random.normal(ks[3], (K, d_we, n_filters), jnp.float32) * 0.1,
        "bc": jax.random.normal(ks[4], (1, n_filters), jnp.float32) * 0.1,
        "Wp": jax.random.normal(ks[5], (d_pref, n_filters), jnp.float32) * 0.1,
        "bp": jax.random.normal(ks[6], (1, n_filters), jnp.float32) * 0.1,
    }
    embedd_words = jax.random.normal(ks[7], (B, L, d_we), jnp.float32)
    u_id = jax.random.randint(ks[8], (B,), 0, n_users, jnp.int32)

    # TODO(synk): dropout layers (dropout_in / cnn dropout) are eval-mode identity here.
    ref = npa_news_encoder_ref(embedd_words, u_id, params)

    out = npa_news_encoder_pallas(embedd_words, u_id, params)
    out = jax.block_until_ready(out)
    assert out.shape == (B, n_filters)
    assert jnp.allclose(out, ref, rtol=1e-2, atol=1e-2), "mismatch vs reference"

    # Also exercise the multi-grid-step path (Bt < B, padded batch).
    out_small = npa_news_encoder_pallas(embedd_words, u_id, params, target_rows=16)
    out_small = jax.block_until_ready(out_small)
    assert jnp.allclose(out_small, ref, rtol=1e-2, atol=1e-2), "mismatch (small tile) vs reference"

    print("KERNEL_OK")
</pallas_src>

<mosaic_0001>
module attributes {stable_mosaic.version = 11 : i64} {
  func.func @npa_news_encoder_kernel(%arg0: i32, %arg1: memref<64x32xbf16, #tpu.memory_space<vmem>>, %arg2: memref<4x1x128xf32, #tpu.memory_space<vmem>>, %arg3: memref<3x32x128xbf16, #tpu.memory_space<vmem>>, %arg4: memref<1x128xf32, #tpu.memory_space<vmem>>, %arg5: memref<4x1x128xf32, #tpu.memory_space<vmem>>) attributes {dimension_semantics = [#tpu.dimension_semantics<parallel>], iteration_bounds = array<i64: 1>, scalar_prefetch = 0 : i64, scratch_operands = 0 : i64, tpu.core_type = #tpu.core_type<tc>, window_params = [{transform_indices = @transform_0, window_bounds = array<i64: 64, 32>}, {transform_indices = @transform_1, window_bounds = array<i64: 4, 1, 128>}, {pipeline_mode = #tpu.pipeline_mode<synchronous>, transform_indices = @transform_2, window_bounds = array<i64: 3, 32, 128>}, {pipeline_mode = #tpu.pipeline_mode<synchronous>, transform_indices = @transform_3, window_bounds = array<i64: 1, 128>}, {transform_indices = @transform_4, window_bounds = array<i64: 4, 1, 128>}]} {
    %c0 = arith.constant 0 : index
    %c0_0 = arith.constant 0 : index
    %0 = vector.load %arg1[%c0, %c0_0] : memref<64x32xbf16, #tpu.memory_space<vmem>>, vector<64x32xbf16>
    %c0_1 = arith.constant 0 : index
    %c0_2 = arith.constant 0 : index
    %c0_3 = arith.constant 0 : index
    %1 = vector.load %arg3[%c0_1, %c0_2, %c0_3] : memref<3x32x128xbf16, #tpu.memory_space<vmem>>, vector<1x32x128xbf16>
    %2 = vector.shape_cast %1 : vector<1x32x128xbf16> to vector<32x128xbf16>
    %cst = arith.constant dense<0.000000e+00> : vector<64x128xf32>
    %3 = tpu.matmul %0, %2, %cst {dimension_numbers = #tpu.dot_dimension_numbers<[1], [0], [0], [1], [0, 0, 1, 1], [], []>} : vector<64x32xbf16>, vector<32x128xbf16>, vector<64x128xf32> -> vector<64x128xf32>
    %c1 = arith.constant 1 : index
    %c0_4 = arith.constant 0 : index
    %c0_5 = arith.constant 0 : index
    %4 = vector.load %arg3[%c1, %c0_4, %c0_5] : memref<3x32x128xbf16, #tpu.memory_space<vmem>>, vector<1x32x128xbf16>
    %5 = vector.shape_cast %4 : vector<1x32x128xbf16> to vector<32x128xbf16>
    %cst_6 = arith.constant dense<0.000000e+00> : vector<64x128xf32>
    %6 = tpu.matmul %0, %5, %cst_6 {dimension_numbers = #tpu.dot_dimension_numbers<[1], [0], [0], [1], [0, 0, 1, 1], [], []>} : vector<64x32xbf16>, vector<32x128xbf16>, vector<64x128xf32> -> vector<64x128xf32>
    %c2 = arith.constant 2 : index
    %c0_7 = arith.constant 0 : index
    %c0_8 = arith.constant 0 : index
    %7 = vector.load %arg3[%c2, %c0_7, %c0_8] : memref<3x32x128xbf16, #tpu.memory_space<vmem>>, vector<1x32x128xbf16>
    %8 = vector.shape_cast %7 : vector<1x32x128xbf16> to vector<32x128xbf16>
    %cst_9 = arith.constant dense<0.000000e+00> : vector<64x128xf32>
    %9 = tpu.matmul %0, %8, %cst_9 {dimension_numbers = #tpu.dot_dimension_numbers<[1], [0], [0], [1], [0, 0, 1, 1], [], []>} : vector<64x32xbf16>, vector<32x128xbf16>, vector<64x128xf32> -> vector<64x128xf32>
    %cst_10 = arith.constant 0.000000e+00 : f32
    %10 = vector.broadcast %cst_10 : f32 to vector<1x128xf32>
    %11 = vector.extract_strided_slice %3 {offsets = [0, 0], sizes = [63, 128], strides = [1, 1]} : vector<64x128xf32> to vector<63x128xf32>
    %12 = tpu.concatenate %10, %11 in 0 : vector<1x128xf32>, vector<63x128xf32> -> vector<64x128xf32>
    %13 = vector.extract_strided_slice %9 {offsets = [1, 0], sizes = [63, 128], strides = [1, 1]} : vector<64x128xf32> to vector<63x128xf32>
    %14 = tpu.concatenate %13, %10 in 0 : vector<63x128xf32>, vector<1x128xf32> -> vector<64x128xf32>
    %15 = arith.addf %6, %12 : vector<64x128xf32>
    %16 = arith.addf %15, %14 : vector<64x128xf32>
    %c0_11 = arith.constant 0 : index
    %c0_12 = arith.constant 0 : index
    %17 = vector.load %arg4[%c0_11, %c0_12] : memref<1x128xf32, #tpu.memory_space<vmem>>, vector<1x128xf32>
    %18 = vector.broadcast %17 : vector<1x128xf32> to vector<64x128xf32>
    %19 = arith.addf %16, %18 : vector<64x128xf32>
    %cst_13 = arith.constant 0.000000e+00 : f32
    %20 = vector.broadcast %cst_13 : f32 to vector<64x128xf32>
    %21 = arith.maximumf %19, %20 : vector<64x128xf32>
    %22 = vector.shape_cast %21 : vector<64x128xf32> to vector<4x16x128xf32>
    %c0_14 = arith.constant 0 : index
    %c0_15 = arith.constant 0 : index
    %c0_16 = arith.constant 0 : index
    %23 = vector.load %arg2[%c0_14, %c0_15, %c0_16] : memref<4x1x128xf32, #tpu.memory_space<vmem>>, vector<4x1x128xf32>
    %24 = vector.broadcast %23 : vector<4x1x128xf32> to vector<4x16x128xf32>
    %25 = arith.mulf %22, %24 : vector<4x16x128xf32>
    %cst_17 = arith.constant dense<0.000000e+00> : vector<4x16xf32>
    %26 = vector.multi_reduction <add>, %25, %cst_17 [2] : vector<4x16x128xf32> to vector<4x16xf32>
    %27 = vector.shape_cast %26 : vector<4x16xf32> to vector<4x16x1xf32>
    %28 = tpu.iota {dimensions = array<i32: 1>} : vector<4x16x1xi32>
    %c10_i32 = arith.constant 10 : i32
    %29 = vector.broadcast %c10_i32 : i32 to vector<4x16x1xi32>
    %30 = arith.cmpi slt, %28, %29 : vector<4x16x1xi32>
    %cst_18 = arith.constant -1.000000e+30 : f32
    %31 = vector.broadcast %cst_18 : f32 to vector<4x16x1xf32>
    %32 = arith.select %30, %27, %31 : vector<4x16x1xi1>, vector<4x16x1xf32>
    %cst_19 = arith.constant dense<0xFF800000> : vector<4x1xf32>
    %33 = vector.multi_reduction <maximumf>, %32, %cst_19 [1] : vector<4x16x1xf32> to vector<4x1xf32>
    %34 = vector.shape_cast %33 : vector<4x1xf32> to vector<4x1x1xf32>
    %35 = vector.broadcast %34 : vector<4x1x1xf32> to vector<4x16x1xf32>
    %36 = arith.subf %32, %35 : vector<4x16x1xf32>
    %37 = math.exp %36 : vector<4x16x1xf32>
    %cst_20 = arith.constant dense<0.000000e+00> : vector<4x1xf32>
    %38 = vector.multi_reduction <add>, %37, %cst_20 [1] : vector<4x16x1xf32> to vector<4x1xf32>
    %39 = vector.shape_cast %38 : vector<4x1xf32> to vector<4x1x1xf32>
    %40 = vector.broadcast %39 : vector<4x1x1xf32> to vector<4x16x1xf32>
    %41 = arith.divf %37, %40 : vector<4x16x1xf32>
    %42 = vector.broadcast %41 : vector<4x16x1xf32> to vector<4x16x128xf32>
    %43 = arith.mulf %42, %22 : vector<4x16x128xf32>
    %cst_21 = arith.constant dense<0.000000e+00> : vector<4x128xf32>
    %44 = vector.multi_reduction <add>, %43, %cst_21 [1] : vector<4x16x128xf32> to vector<4x128xf32>
    %45 = vector.shape_cast %44 : vector<4x128xf32> to vector<4x1x128xf32>
    %c0_22 = arith.constant 0 : index
    %c0_23 = arith.constant 0 : index
    %c0_24 = arith.constant 0 : index
    %46 = vector.load %arg5[%c0_22, %c0_23, %c0_24] : memref<4x1x128xf32, #tpu.memory_space<vmem>>, vector<4x1x128xf32>
    tpu.vector_store %arg5[%c0_22, %c0_23, %c0_24], %45 {strides = array<i32>} : memref<4x1x128xf32, #tpu.memory_space<vmem>>, vector<4x1x128xf32>,
    return
  }
  func.func @transform_0(%arg0: i32) -> (i32, i32) {
    %c0_i32 = arith.constant 0 : i32
    %c0_i32_0 = arith.constant 0 : i32
    return %arg0, %c0_i32 : i32, i32
  }
  func.func @transform_1(%arg0: i32) -> (i32, i32, i32) {
    %c0_i32 = arith.constant 0 : i32
    %c0_i32_0 = arith.constant 0 : i32
    %c0_i32_1 = arith.constant 0 : i32
    return %arg0, %c0_i32, %c0_i32_0 : i32, i32, i32
  }
  func.func @transform_2(%arg0: i32) -> (i32, i32, i32) {
    %c0_i32 = arith.constant 0 : i32
    %c0_i32_0 = arith.constant 0 : i32
    %c0_i32_1 = arith.constant 0 : i32
    %c0_i32_2 = arith.constant 0 : i32
    return %c0_i32, %c0_i32_0, %c0_i32_1 : i32, i32, i32
  }
  func.func @transform_3(%arg0: i32) -> (i32, i32) {
    %c0_i32 = arith.constant 0 : i32
    %c0_i32_0 = arith.constant 0 : i32
    %c0_i32_1 = arith.constant 0 : i32
    return %c0_i32, %c0_i32_0 : i32, i32
  }
  func.func @transform_4(%arg0: i32) -> (i32, i32, i32) {
    %c0_i32 = arith.constant 0 : i32
    %c0_i32_0 = arith.constant 0 : i32
    %c0_i32_1 = arith.constant 0 : i32
    return %arg0, %c0_i32, %c0_i32_0 : i32, i32, i32
  }
}

</mosaic_0001>

<bundles_post_ra>
// kernel: tpu_custom_call.1
= control target key start
LH: loop header
LB: loop body
LE: loop exit
PB: predicated region body
PF: predicated region fallthrough
CT: control target
= control target key end

     0   :  { %9 = vsyncpa [#allocation3], 0  ;;  %s934_s0 = inlined_call_operand.vmem [shape: bf16[64,32], index: 0, kind: input, shape index: {}]   ;;  %s935_s1 = inlined_call_operand.hbm [shape: f32[4,1,128], index: 1, kind: input, shape index: {}]   ;;  %s936_s2 = inlined_call_operand.vmem [shape: bf16[3,32,128], index: 2, kind: input, shape index: {}]   ;;  %s937_s3 = inlined_call_operand.vmem [shape: f32[1,128], index: 3, kind: input, shape index: {}]   ;;  %s938_s4 = inlined_call_operand.hbm [shape: f32[4,1,128], index: 4, kind: output, shape index: {}]  }
   0x1   :  { %10 = vsyncpa [#allocation4], 0  ;;  %s17_s17 = sshll.u32 %s935_s1, 4  ;;  %s724_s18 = smov [#allocation2]   ;;  %s18_s17 = int_to_ptr.hbm [resolvable:$true] %s17_s17 }
   0x2   :  { %s19_s19 = sshll.u32 %s724_s18, 4  ;;  %s725_s20 = smov 16   ;;  %s20_s19 = int_to_ptr.vmem [resolvable:$true] %s19_s19 }
   0x3   :  { %s726_s21 = smov 1  }
   0x4   :  { %25 = dma.hbm_to_vmem [thread:$0]  %s18_s17, 64, %s20_s19, [#allocation3], %s725_s20, %s725_s20, %s726_s21  }
   0x5   :  { %720 = dma.done.wait [#allocation3], 64  }
   0x6   :  { %721 = vsyncadd [#allocation3], 4294967232  ;;  %v628_v0 = vld [vmem:[%s936_s2 + $0x8] sm:$0xff]  ;;  %v630_v2 = vld [vmem:[%s936_s2 + $0x18] sm:$0xff]  ;;  %vm79_vm0 = vcmask 261120   ;;  %vm180_vm1 = vcmask 1040384  }
   0x7   :  { %v632_v1 = vld [vmem:[%s936_s2 + $0x28] sm:$0xff]  ;;  %98 = vmatpush.bf16.msra.mxu0 %v628_v0  ;;  %633 = vmatpush.bf16.msra.mxu3 %v628_v0  ;;  %v627_v3 = vld [vmem:[%s936_s2] sm:$0xff]  ;;  %v629_v5 = vld [vmem:[%s936_s2 + $0x10] sm:$0xff]  ;;  %vm213_vm2 = vcmask 1046528   ;;  %s550_s18 = sshll.u32 %s938_s4, 4  ;;  %s551_s18 = int_to_ptr.hbm [resolvable:$true] %s550_s18 }
   0x8   :  { %v631_v4 = vld [vmem:[%s936_s2 + $0x20] sm:$0xff]  ;;  %635 = vmatpush.bf16.msra.mxu1 %v632_v1  ;;  %637 = vmatpush.bf16.msra.mxu2 %v630_v2  ;;  %v624_v7 = vld [vmem:[%s934_s0 + $0x8] sm:$0xff]  ;;  %v625_v8 = vld [vmem:[%s934_s0 + $0x10] sm:$0xff] }
   0x9   :  { %v623_v6 = vld [vmem:[%s934_s0] sm:$0xff]  ;;  %v626_v9 = vld [vmem:[%s934_s0 + $0x18] sm:$0xff] }
   0xa   :  { %v810_v28 = vld [vmem:[%s937_s3] ss:$0 sm:$0xff]  ;;  %v644_v36 = vld [vmem:[#allocation2 + $0x1] ss:$0 sm:$0xff]  ;;  %s727_s3 = smov [#allocation5]  }
   0xb   :  { %99 = vmatpush.bf16.msra.mxu0 %v627_v3  ;;  %634 = vmatpush.bf16.msra.mxu3 %v627_v3  ;;  %v645_v62 = vld [vmem:[#allocation2] ss:$0 sm:$0xff]  ;;  %s548_s15 = sshll.u32 %s727_s3, 4  ;;  %s549_s15 = int_to_ptr.vmem [resolvable:$true] %s548_s15 }
   0xc   :  { %636 = vmatpush.bf16.msra.mxu1 %v631_v4  ;;  %638 = vmatpush.bf16.msra.mxu2 %v629_v5 }
   0xe   :  { %587 = vmatmul.msk.bf16.vlgmr.msra.gmra.mxu0 %vm79_vm0, %v623_v6  ;;  %588 = vmatmul.msk.bf16.vlgmr.msra.gmra.mxu3 %vm79_vm0, %v624_v7 }
   0xf   :  { %149 = vmatpush.bf16.msrb.mxu0 %v632_v1  ;;  %608 = vmatmul.msk.bf16.vlgmr.msra.gmra.mxu1 %vm79_vm0, %v624_v7 }
  0x10   :  { %620 = vmatmul.msk.bf16.vlgmr.msra.gmra.mxu2 %vm79_vm0, %v624_v7 }
  0x13   :  { %150 = vmatpush.bf16.msrb.mxu0 %v631_v4 }
  0x17   :  { %256 = vmatpush.bf16.msra.mxu0 %v630_v2 }
  0x1b   :  { %257 = vmatpush.bf16.msra.mxu0 %v629_v5 }
  0x1e   :  { %589 = vmatmul.msk.bf16.gmra.mxu3 %vm79_vm0, %v625_v8  ;;  %607 = vmatmul.msk.bf16.vlgmr.msrb.gmra.mxu0 %vm79_vm0, %v623_v6 }
  0x1f   :  { %609 = vmatmul.msk.bf16.gmra.mxu1 %vm79_vm0, %v625_v8 }
  0x20   :  { %621 = vmatmul.msk.bf16.gmra.mxu2 %vm79_vm0, %v625_v8 }
  0x2e   :  { %590 = vmatmul.msk.bf16.gmra.mxu3 %vm79_vm0, %v626_v9  ;;  %619 = vmatmul.msk.bf16.vlgmr.msra.gmra.mxu0 %vm79_vm0, %v623_v6 }
  0x2f   :  { %610 = vmatmul.msk.bf16.gmra.mxu1 %vm79_vm0, %v626_v9 }
  0x30   :  { %622 = vmatmul.msk.bf16.gmra.mxu2 %vm79_vm0, %v626_v9 }
  0x8b   :  { %v801_v10 = vpop.f32.mrf.mxu0 }
  0x8c   :  { %v803_v11 = vpop.f32.mrf.mxu1  ;;  %v181_v38 = vrot.slane %v801_v10, 7 }
  0x8d   :  { %v217_v43 = vrot.slane %v803_v11, 1 }
  0x8e   :  { %v204_v48 = vsel %vm180_vm1, 0.0, %v181_v38 }
  0x91   :  { %v106_v12 = vpop.f32.mrf.mxu3 }
  0x92   :  { %v184_v17 = vrot.slane %v106_v12, 7  ;;  %v646_v12 = vld [vmem:[#allocation2 + $0x2] ss:$0 sm:$0xff] }
  0x93   :  { %v264_v13 = vpop.f32.mrf.mxu2  ;;  %v103_v14 = vpop.f32.mrf.mxu0 }
  0x94   :  { %v159_v15 = vpop.f32.mrf.mxu1  ;;  %v182_v33 = vrot.slane %v103_v14, 7 }
  0x95   :  { %v219_v23 = vrot.slane %v159_v15, 1 }
  0x96   :  { %v185_v39 = vsel %vm180_vm1, %v182_v33, %v184_v17  ;;  %v183_v5 = vsel %vm180_vm1, %v181_v38, %v182_v33 }
  0x97   :  { %v265_v47 = vadd.f32 %v264_v13, %v185_v39  ;;  %v220_v57 = vsel %vm213_vm2, %v217_v43, %v219_v23 }
  0x99   :  { %v108_v16 = vpop.f32.mrf.mxu3  ;;  %v281_v60 = vadd.f32 %v265_v47, %v220_v57 }
  0x9a   :  { %v186_v18 = vrot.slane %v108_v16, 7 }
  0x9b   :  { %v266_v19 = vpop.f32.mrf.mxu2  ;;  %v152_v20 = vpop.f32.mrf.mxu0  ;;  %v836_v7 = vadd.f32 %v810_v28, %v281_v60 }
  0x9c   :  { %v187_v21 = vsel %vm180_vm1, %v184_v17, %v186_v18  ;;  %v162_v22 = vpop.f32.mrf.mxu1  ;;  %v214_v40 = vrot.slane %v152_v20, 1 }
  0x9d   :  { %v267_v24 = vadd.f32 %v266_v19, %v187_v21  ;;  %v221_v25 = vrot.slane %v162_v22, 1  ;;  %v301_v20 = vmax.f32 %v836_v7, 0.0 }
  0x9f   :  { %v222_v26 = vsel %vm213_vm2, %v219_v23, %v221_v25 }
  0xa0   :  { %v282_v27 = vadd.f32 %v267_v24, %v222_v26 }
  0xa1   :  { %v111_v29 = vpop.f32.mrf.mxu3 }
  0xa2   :  { %v813_v31 = vadd.f32 %v810_v28, %v282_v27  ;;  %v188_v44 = vrot.slane %v111_v29, 7 }
  0xa3   :  { %v269_v30 = vpop.f32.mrf.mxu2  ;;  %v154_v32 = vpop.f32.mrf.mxu0 }
  0xa4   :  { %v164_v34 = vpop.f32.mrf.mxu1  ;;  %v302_v35 = vmax.f32 %v813_v31, 0.0  ;;  %v215_v41 = vrot.slane %v154_v32, 1  ;;  %v189_v0 = vsel %vm180_vm1, %v186_v18, %v188_v44  ;;  %v325_v32 = vmul.f32 %v644_v36, %v301_v20 }
  0xa5   :  { %v223_v53 = vrot.slane %v164_v34, 1  ;;  %v270_v8 = vadd.f32 %v269_v30, %v189_v0 }
  0xa6   :  { %v326_v37 = vmul.f32 %v644_v36, %v302_v35  ;;  %v216_v56 = vsel %vm213_vm2, %v214_v40, %v215_v41  ;;  %v218_v14 = vsel %vm213_vm2, %v215_v41, %v217_v43 }
  0xa7   :  { %v224_v13 = vsel %vm213_vm2, %v221_v25, %v223_v53 }
  0xa8   :  { %337 = vadd.xlane.f32.xlu0 %v326_v37  ;;  %v283_v21 = vadd.f32 %v270_v8, %v224_v13 }
  0xa9   :  { %v113_v42 = vpop.f32.mrf.mxu3 }
  0xaa   :  { %v190_v45 = vrot.slane %v113_v42, 7  ;;  %v857_v33 = vadd.f32 %v810_v28, %v283_v21 }
  0xab   :  { %v271_v46 = vpop.f32.mrf.mxu2  ;;  %v259_v49 = vpop.f32.mrf.mxu0 }
  0xac   :  { %v191_v50 = vsel %vm180_vm1, %v188_v44, %v190_v45  ;;  %v167_v51 = vpop.f32.mrf.mxu1  ;;  %v260_v52 = vadd.f32 %v259_v49, %v204_v48  ;;  %v303_v41 = vmax.f32 %v857_v33, 0.0  ;;  %v647_v44 = vld [vmem:[#allocation2 + $0x3] ss:$0 sm:$0xff] }
  0xad   :  { %v272_v54 = vadd.f32 %v271_v46, %v191_v50  ;;  %v225_v55 = vrot.slane %v167_v51, 1  ;;  %v347_v50 = vlaneseq }
  0xae   :  { %v279_v58 = vadd.f32 %v260_v52, %v216_v56 }
  0xaf   :  { %v226_v59 = vsel %vm213_vm2, %v223_v53, %v225_v55  ;;  %v348_v51 = vshrl.u32 %v347_v50, 7 }
  0xb0   :  { %v827_v61 = vadd.f32 %v810_v28, %v279_v58  ;;  %v284_v63 = vadd.f32 %v272_v54, %v226_v59 }
  0xb1   :  { %v116_v1 = vpop.f32.mrf.mxu3  ;;  %v349_v54 = vadd.s32 8, %v348_v51 }
  0xb2   :  { %v299_v3 = vmax.f32 %v827_v61, 0.0  ;;  %v832_v4 = vadd.f32 %v810_v28, %v284_v63  ;;  %v192_v15 = vrot.slane %v116_v1, 7 }
  0xb3   :  { %v274_v2 = vpop.f32.mrf.mxu2  ;;  %v261_v6 = vpop.f32.mrf.mxu0  ;;  %vm351_vm3 = vcmp.lt.s32.totalorder %v349_v54, 10 }
  0xb4   :  { %v262_v9 = vadd.f32 %v261_v6, %v183_v5  ;;  %v323_v10 = vmul.f32 %v645_v62, %v299_v3  ;;  %v304_v11 = vmax.f32 %v832_v4, 0.0  ;;  %v169_v18 = vpop.f32.mrf.mxu1  ;;  %v193_v23 = vsel %vm180_vm1, %v190_v45, %v192_v15 }
  0xb5   :  { %v227_v24 = vrot.slane %v169_v18, 1  ;;  %v275_v34 = vadd.f32 %v274_v2, %v193_v23  ;;  %v327_v45 = vmul.f32 %v646_v12, %v303_v41 }
  0xb6   :  { %v280_v16 = vadd.f32 %v262_v9, %v218_v14  ;;  %331 = vadd.xlane.f32.xlu2 %v323_v10  ;;  %v328_v17 = vmul.f32 %v646_v12, %v304_v11 }
  0xb7   :  { %v228_v38 = vsel %vm213_vm2, %v225_v55, %v227_v24  ;;  %v237_v39 = vsel %vm213_vm2, %v227_v24, 0.0 }
  0xb8   :  { %341 = vadd.xlane.f32.xlu1 %v328_v17  ;;  %v846_v19 = vadd.f32 %v810_v28, %v280_v16  ;;  %v285_v42 = vadd.f32 %v275_v34, %v228_v38 }
  0xb9   :  { %v118_v22 = vpop.f32.mrf.mxu3 }
  0xba   :  { %v194_v25 = vrot.slane %v118_v22, 7  ;;  %v300_v26 = vmax.f32 %v846_v19, 0.0  ;;  %v871_v47 = vadd.f32 %v810_v28, %v285_v42 }
  0xbb   :  { %v276_v29 = vpop.f32.mrf.mxu2 }
  0xbc   :  { %v195_v27 = vsel %vm180_vm1, %v192_v15, %v194_v25  ;;  %v324_v30 = vmul.f32 %v645_v62, %v300_v26  ;;  %v305_v48 = vmax.f32 %v871_v47, 0.0 }
  0xbd   :  { %v277_v37 = vadd.f32 %v276_v29, %v195_v27 }
  0xbe   :  { %333 = vadd.xlane.f32.xlu0 %v324_v30  ;;  %335 = vadd.xlane.f32.xlu2 %v325_v32  ;;  %v329_v49 = vmul.f32 %v647_v44, %v305_v48 }
  0xbf   :  { %v286_v40 = vadd.f32 %v277_v37, %v237_v39 }
  0xc1   :  { %v863_v43 = vadd.f32 %v810_v28, %v286_v40 }
  0xc3   :  { %v306_v36 = vmax.f32 %v863_v43, 0.0 }
  0xc5   :  { %v330_v46 = vmul.f32 %v647_v44, %v306_v36 }
  0xc6   :  { %339 = vadd.xlane.f32.xlu0 %v327_v45 }
  0xc7   :  { %345 = vadd.xlane.f32.xlu1 %v330_v46 }
  0xcf   :  { %343 = vadd.xlane.f32.xlu1 %v329_v49 }
 0x11b   :  { %v338_v52 = vpop.xlane.xlu0 %337 }
 0x11c   :  { %v355_v55 = vsel %vm351_vm3, %v338_v52, -1e+30 }
 0x129   :  { %v332_v53 = vpop.xlane.xlu2 %331 }
 0x12b   :  { %v342_v28 = vpop.xlane.xlu1 %341 }
 0x12c   :  { %v357_v5 = vsel %vm351_vm3, %v342_v28, -1e+30 }
 0x131   :  { %v334_v56 = vpop.xlane.xlu0 %333  ;;  %v336_v57 = vpop.xlane.xlu2 %335 }
 0x132   :  { %v353_v58 = vsel %vm351_vm3, %v334_v56, -1e+30  ;;  %v367_v59 = vmax.f32 %v336_v57, %v355_v55 }
 0x133   :  { %v360_v60 = vmax.f32 %v332_v53, %v353_v58 }
 0x134   :  { %v368_v62 = vrot.slane %v367_v59, 4 }
 0x135   :  { %v361_v63 = vrot.slane %v360_v60, 4 }
 0x136   :  { %v369_v0 = vmax.f32 %v367_v59, %v368_v62 }
 0x137   :  { %v362_v1 = vmax.f32 %v360_v60, %v361_v63 }
 0x138   :  { %v370_v2 = vrot.slane %v369_v0, 2 }
 0x139   :  { %v363_v6 = vrot.slane %v362_v1, 2  ;;  %v340_v8 = vpop.xlane.xlu0 %339 }
 0x13a   :  { %v371_v9 = vmax.f32 %v369_v0, %v370_v2  ;;  %v374_v10 = vmax.f32 %v340_v8, %v357_v5  ;;  %v346_v12 = vpop.xlane.xlu1 %345 }
 0x13b   :  { %v364_v13 = vmax.f32 %v362_v1, %v363_v6  ;;  %v359_v32 = vsel %vm351_vm3, %v346_v12, -1e+30 }
 0x13c   :  { %v372_v14 = vrot.slane %v371_v9, 1  ;;  %v375_v15 = vrot.slane %v374_v10, 4 }
 0x13d   :  { %v365_v16 = vrot.slane %v364_v13, 1 }
 0x13e   :  { %v373_v17 = vmax.f32 %v371_v9, %v372_v14  ;;  %v376_v18 = vmax.f32 %v374_v10, %v375_v15 }
 0x13f   :  { %v366_v21 = vmax.f32 %v364_v13, %v365_v16 }
 0x140   :  { %v390_v22 = vsub.f32 %v336_v57, %v373_v17  ;;  %v391_v23 = vsub.f32 %v355_v55, %v373_v17  ;;  %v377_v24 = vrot.slane %v376_v18, 2 }
 0x141   :  { %v388_v25 = vsub.f32 %v332_v53, %v366_v21  ;;  %v389_v27 = vsub.f32 %v353_v58, %v366_v21 }
 0x142   :  { %v400_v29 = vmul.f32 1.442695, %v390_v22  ;;  %v378_v30 = vmax.f32 %v376_v18, %v377_v24  ;;  %v344_v34 = vpop.xlane.xlu1 %343  ;;  %v402_v39 = vmul.f32 1.442695, %v391_v23 }
 0x143   :  { %v396_v37 = vmul.f32 1.442695, %v388_v25  ;;  %v398_v38 = vmul.f32 1.442695, %v389_v27  ;;  %v381_v40 = vmax.f32 %v344_v34, %v359_v32 }
 0x144   :  { %648 = vpow2.f32 %v400_v29  ;;  %v379_v42 = vrot.slane %v378_v30, 1 }
 0x145   :  { %650 = vpow2.f32 %v396_v37  ;;  %v382_v44 = vrot.slane %v381_v40, 4 }
 0x146   :  { %652 = vpow2.f32 %v398_v38  ;;  %v380_v45 = vmax.f32 %v378_v30, %v379_v42 }
 0x147   :  { %654 = vpow2.f32 %v402_v39  ;;  %v383_v46 = vmax.f32 %v381_v40, %v382_v44 }
 0x148   :  { %v392_v49 = vsub.f32 %v340_v8, %v380_v45  ;;  %v393_v50 = vsub.f32 %v357_v5, %v380_v45 }
 0x149   :  { %v384_v51 = vrot.slane %v383_v46, 2 }
 0x14a   :  { %v880_v52 = vpop.eup %648  ;;  %v404_v53 = vmul.f32 1.442695, %v392_v49  ;;  %v406_v54 = vmul.f32 1.442695, %v393_v50 }
 0x14b   :  { %v882_v55 = vpop.eup %650  ;;  %v385_v56 = vmax.f32 %v383_v46, %v384_v51 }
 0x14c   :  { %v884_v57 = vpop.eup %652  ;;  %656 = vpow2.f32 %v404_v53 }
 0x14d   :  { %v886_v28 = vpop.eup %654  ;;  %v412_v58 = vadd.f32 %v884_v57, %v882_v55  ;;  %658 = vpow2.f32 %v406_v54  ;;  %v386_v59 = vrot.slane %v385_v56, 1 }
 0x14e   :  { %v419_v60 = vadd.f32 %v886_v28, %v880_v52 }
 0x14f   :  { %v413_v62 = vrot.slane %v412_v58, 4  ;;  %v387_v63 = vmax.f32 %v385_v56, %v386_v59 }
 0x150   :  { %v420_v0 = vrot.slane %v419_v60, 4 }
 0x151   :  { %v414_v1 = vadd.f32 %v413_v62, %v412_v58  ;;  %v394_v2 = vsub.f32 %v344_v34, %v387_v63  ;;  %v395_v5 = vsub.f32 %v359_v32, %v387_v63 }
 0x152   :  { %v892_v6 = vpop.eup %656  ;;  %v421_v8 = vadd.f32 %v420_v0, %v419_v60 }
 0x153   :  { %v894_v9 = vpop.eup %658  ;;  %v415_v10 = vrot.slane %v414_v1, 2  ;;  %v408_v12 = vmul.f32 1.442695, %v394_v2  ;;  %v410_v13 = vmul.f32 1.442695, %v395_v5 }
 0x154   :  { %v422_v14 = vrot.slane %v421_v8, 2  ;;  %v426_v15 = vadd.f32 %v894_v9, %v892_v6 }
 0x155   :  { %v416_v16 = vadd.f32 %v415_v10, %v414_v1  ;;  %660 = vpow2.f32 %v408_v12 }
 0x156   :  { %v423_v17 = vadd.f32 %v422_v14, %v421_v8  ;;  %v427_v18 = vrot.slane %v426_v15, 4  ;;  %662 = vpow2.f32 %v410_v13 }
 0x157   :  { %v417_v21 = vrot.slane %v416_v16, 1 }
 0x158   :  { %v424_v22 = vrot.slane %v423_v17, 1  ;;  %v428_v23 = vadd.f32 %v427_v18, %v426_v15 }
 0x159   :  { %v418_v24 = vadd.f32 %v417_v21, %v416_v16 }
 0x15a   :  { %v425_v25 = vadd.f32 %v424_v22, %v423_v17  ;;  %v429_v27 = vrot.slane %v428_v23, 2 }
 0x15b   :  { %v898_v29 = vpop.eup %660  ;;  %664 = vrcp.f32 %v418_v24  ;;  %v449_v51 = vand.u32 2147483647, %v418_v24  ;;  %v451_v53 = vand.u32 2147483648, %v418_v24  ;;  %vm445_vm6 = vweird.f32 %v418_v24 }
 0x15c   :  { %v900_v30 = vpop.eup %662  ;;  %666 = vrcp.f32 %v425_v25  ;;  %v430_v32 = vadd.f32 %v429_v27, %v428_v23  ;;  %v467_v58 = vand.u32 2147483648, %v425_v25  ;;  %v465_v62 = vand.u32 2147483647, %v425_v25 }
 0x15d   :  { %v433_v34 = vadd.f32 %v900_v30, %v898_v29  ;;  %vm450_vm8 = vcmp.eq.f32.partialorder %v449_v51, 8.507059e+37  ;;  %v452_v2 = vor.u32 1.1754944e-38, %v451_v53  ;;  %vm461_vm9 = vweird.f32 %v425_v25 }
 0x15e   :  { %v431_v37 = vrot.slane %v430_v32, 1  ;;  %v468_v10 = vor.u32 1.1754944e-38, %v467_v58  ;;  %vm466_vm11 = vcmp.eq.f32.partialorder %v465_v62, 8.507059e+37 }
 0x15f   :  { %v434_v38 = vrot.slane %v433_v34, 4 }
 0x160   :  { %v432_v40 = vadd.f32 %v431_v37, %v430_v32 }
 0x161   :  { %v665_v39 = vpop.eup %664  ;;  %v435_v42 = vadd.f32 %v434_v38, %v433_v34 }
 0x162   :  { %v667_v44 = vpop.eup %666  ;;  %v441_v45 = vmul.f32 %v665_v39, %v418_v24  ;;  %668 = vrcp.f32 %v432_v40  ;;  %vm446_vm4 = vweird.f32 %v665_v39  ;;  %v481_v16 = vand.u32 2147483647, %v432_v40 }
 0x163   :  { %v457_v46 = vmul.f32 %v667_v44, %v425_v25  ;;  %v436_v50 = vrot.slane %v435_v42, 2  ;;  %vm462_vm5 = vweird.f32 %v667_v44  ;;  %vm447_vm7 = vmor %vm445_vm6, %vm446_vm4  ;;  %v483_v25 = vand.u32 2147483648, %v432_v40 }
 0x164   :  { %v442_v49 = vsub.f32 1.0, %v441_v45  ;;  %vm463_vm10 = vmor %vm461_vm9, %vm462_vm5  ;;  %vm477_vm13 = vweird.f32 %v432_v40  ;;  %vm482_vm15 = vcmp.eq.f32.partialorder %v481_v16, 8.507059e+37 }
 0x165   :  { %v458_v54 = vsub.f32 1.0, %v457_v46  ;;  %v437_v59 = vadd.f32 %v436_v50, %v435_v42  ;;  %v484_v38 = vor.u32 1.1754944e-38, %v483_v25 }
 0x166   :  { %v443_v56 = vmul.f32 %v665_v39, %v442_v49 }
 0x167   :  { %v459_v60 = vmul.f32 %v667_v44, %v458_v54  ;;  %v438_v0 = vrot.slane %v437_v59, 1 }
 0x168   :  { %v444_v63 = vadd.f32 %v665_v39, %v443_v56  ;;  %v669_v1 = vpop.eup %668 }
 0x169   :  { %v460_v5 = vadd.f32 %v667_v44, %v459_v60  ;;  %v473_v12 = vmul.f32 %v669_v1, %v432_v40  ;;  %v439_v13 = vadd.f32 %v438_v0, %v437_v59  ;;  %vm478_vm12 = vweird.f32 %v669_v1 }
 0x16a   :  { %v448_v8 = vsel %vm447_vm7, %v665_v39, %v444_v63  ;;  %vm479_vm14 = vmor %vm477_vm13, %vm478_vm12 }
 0x16b   :  { %v453_v14 = vsel %vm450_vm8, %v452_v2, %v448_v8  ;;  %v464_v15 = vsel %vm463_vm10, %v667_v44, %v460_v5  ;;  %v474_v22 = vsub.f32 1.0, %v473_v12  ;;  %670 = vrcp.f32 %v439_v13 }
 0x16c   :  { %v454_v17 = vmul.f32 %v882_v55, %v453_v14  ;;  %v455_v18 = vmul.f32 %v884_v57, %v453_v14  ;;  %v469_v21 = vsel %vm466_vm11, %v468_v10, %v464_v15  ;;  %v497_v50 = vand.u32 2147483647, %v439_v13 }
 0x16d   :  { %v470_v23 = vmul.f32 %v880_v52, %v469_v21  ;;  %v471_v24 = vmul.f32 %v886_v28, %v469_v21  ;;  %v475_v34 = vmul.f32 %v669_v1, %v474_v22  ;;  %v499_v51 = vand.u32 2147483648, %v439_v13 }
 0x16e   :  { %v504_v27 = vmul.f32 %v454_v17, %v299_v3  ;;  %v505_v32 = vmul.f32 %v455_v18, %v300_v26  ;;  %vm493_vm1 = vweird.f32 %v439_v13  ;;  %vm498_vm3 = vcmp.eq.f32.partialorder %v497_v50, 8.507059e+37 }
 0x16f   :  { %v506_v55 = vmul.f32 %v470_v23, %v301_v20  ;;  %v507_v57 = vmul.f32 %v471_v24, %v302_v35  ;;  %v476_v52 = vadd.f32 %v669_v1, %v475_v34  ;;  %v500_v60 = vor.u32 1.1754944e-38, %v499_v51 }
 0x170   :  { %v512_v37 = vadd.f32 %v505_v32, %v504_v27 }
 0x171   :  { %v519_v28 = vadd.f32 %v507_v57, %v506_v55  ;;  %v480_v61 = vsel %vm479_vm14, %v669_v1, %v476_v52  ;;  %v671_v3 = vpop.eup %670 }
 0x172   :  { %v513_v39 = vrot.slane %v512_v37, 4  ;;  %v485_v26 = vsel %vm482_vm15, %v484_v38, %v480_v61  ;;  %v489_v20 = vmul.f32 %v671_v3, %v439_v13  ;;  %vm494_vm0 = vweird.f32 %v671_v3 }
 0x173   :  { %v520_v19 = vrot.slane %v519_v28, 4  ;;  %v486_v44 = vmul.f32 %v892_v6, %v485_v26  ;;  %v487_v7 = vmul.f32 %v894_v9, %v485_v26  ;;  %vm495_vm2 = vmor %vm493_vm1, %vm494_vm0 }
 0x174   :  { %v514_v42 = vadd.f32 %v513_v39, %v512_v37  ;;  %v490_v46 = vsub.f32 1.0, %v489_v20 }
 0x175   :  { %v521_v31 = vadd.f32 %v520_v19, %v519_v28  ;;  %v508_v40 = vmul.f32 %v486_v44, %v303_v41  ;;  %v509_v45 = vmul.f32 %v487_v7, %v304_v11 }
 0x176   :  { %v515_v35 = vrot.slane %v514_v42, 2  ;;  %v491_v54 = vmul.f32 %v671_v3, %v490_v46 }
 0x177   :  { %v522_v49 = vrot.slane %v521_v31, 2  ;;  %v526_v53 = vadd.f32 %v509_v45, %v508_v40 }
 0x178   :  { %v516_v56 = vadd.f32 %v515_v35, %v514_v42  ;;  %v492_v9 = vadd.f32 %v671_v3, %v491_v54 }
 0x179   :  { %v523_v6 = vadd.f32 %v522_v49, %v521_v31  ;;  %v527_v58 = vrot.slane %v526_v53, 4 }
 0x17a   :  { %v517_v59 = vrot.slane %v516_v56, 1  ;;  %v496_v62 = vsel %vm495_vm2, %v671_v3, %v492_v9 }
 0x17b   :  { %v524_v33 = vrot.slane %v523_v6, 1  ;;  %v528_v41 = vadd.f32 %v527_v58, %v526_v53  ;;  %v501_v11 = vsel %vm498_vm3, %v500_v60, %v496_v62 }
 0x17c   :  { %v518_v4 = vadd.f32 %v517_v59, %v516_v56  ;;  %v502_v1 = vmul.f32 %v898_v29, %v501_v11  ;;  %v503_v2 = vmul.f32 %v900_v30, %v501_v11 }
 0x17d   :  { %v525_v63 = vadd.f32 %v524_v33, %v523_v6  ;;  %v529_v0 = vrot.slane %v528_v41, 2 }
 0x17e   :  { %540 = vst [vmem:[#allocation5] sm:$0x1] %v518_v4  ;;  %v510_v5 = vmul.f32 %v502_v1, %v305_v48  ;;  %v511_v8 = vmul.f32 %v503_v2, %v306_v36 }
 0x17f   :  { %541 = vst [vmem:[#allocation5 + $0x1] sm:$0x1] %v525_v63  ;;  %v530_v10 = vadd.f32 %v529_v0, %v528_v41 }
 0x180   :  { %v533_v12 = vadd.f32 %v511_v8, %v510_v5 }
 0x181   :  { %v531_v13 = vrot.slane %v530_v10, 1 }
 0x182   :  { %v534_v14 = vrot.slane %v533_v12, 4 }
 0x183   :  { %v532_v15 = vadd.f32 %v531_v13, %v530_v10 }
 0x184   :  { %v535_v16 = vadd.f32 %v534_v14, %v533_v12 }
 0x185   :  { %542 = vst [vmem:[#allocation5 + $0x2] sm:$0x1] %v532_v15 }
 0x186   :  { %v536_v17 = vrot.slane %v535_v16, 2 }
 0x188   :  { %v537_v18 = vadd.f32 %v536_v17, %v535_v16 }
 0x18a   :  { %v538_v47 = vrot.slane %v537_v18, 1 }
 0x18c   :  { %v539_v48 = vadd.f32 %v538_v47, %v537_v18 }
 0x18e   :  { %543 = vst [vmem:[#allocation5 + $0x3] sm:$0x1] %v539_v48 }
 0x18f   :  { %556 = dma.vmem_to_hbm [thread:$0]  %s549_s15, 64, %s551_s18, [#allocation4], %s725_s20, %s725_s20, %s726_s21  }
 0x190   :  { %722 = dma.done.wait [#allocation4], 64  }
 0x191   :  { %723 = vsyncadd [#allocation4], 4294967232 }
 0x192   :  { %561 = vsyncpa [#allocation3], 1 }
 0x193   :  { %562 = vsyncpa [#allocation4], 1 }

</bundles_post_ra>
